<compile_context>
chip_gen: v7x
topology: tpu7x:2x2x1
jax: 0.10.0
libtpu: 0.0.40
codegen_flags: <defaults>
</compile_context>

<pallas_src>
import functools
import math

import jax
import jax.numpy as jnp
from jax import lax
from jax.experimental import pallas as pl
from jax.experimental.pallas import tpu as pltpu

_LANE = 128
_SUB = 8
_TARGET_STEP_BYTES = 8 * 1024 * 1024    # ~8 MiB of input per grid step
_VMEM_LIMIT_BYTES = 32 * 1024 * 1024    # above v5e's 16 MiB default, <= v7x physical


def _cdiv(a, b):
    return (a + b - 1) // b


def _round_up(a, b):
    return _cdiv(a, b) * b


def _min_sublanes(dtype) -> int:
    # Minimum second-minor tile size for the dtype: f32 -> 8, bf16 -> 16, int8 -> 32.
    return max(_SUB, 32 // jnp.dtype(dtype).itemsize)


def _tensorcores_per_device() -> int:
    """TensorCores addressable by one pallas_call (1 on v5e/v6e, 2 on v7x)."""
    try:
        dev = jax.devices()[0]
        if getattr(dev, "platform", "") != "tpu":
            return 1
        return max(1, min(2, int(getattr(dev, "num_cores", 1))))
    except Exception:
        return 1


def _asym_sim_kernel(yp_ref, y_ref, out_ref, *, tm, sub, total_rows,
                     tiles_per_slice, emit_ragged, unroll):
    """Accumulates [sum(yp*y), sum(yp), sum(y)] into a (1, 3, 8, 128) f32 block."""
    p = pl.program_id(0)
    t = pl.program_id(1)

    @pl.when(t == 0)
    def _():
        out_ref[...] = jnp.zeros_like(out_ref)

    n_chunks = tm // sub
    row0 = (p * tiles_per_slice + t) * tm          # logical (unclamped) start row

    def accumulate(masked):
        def fold(x):
            # (sub, 128) -> (sub//8, 8, 128) is layout-preserving; the axis-0 sum
            # is plain vreg element-wise adds (no XLU in the hot loop).
            return jnp.sum(x.reshape(sub // _SUB, _SUB, _LANE), axis=0)

        def body(i, carry):
            a_pp, a_p, a_t = carry
            r = pl.multiple_of(i * sub, sub)
            # Single pass: each yp/yt slab is loaded exactly once; no `prod`
            # tile is ever materialized to VMEM.
            yp = yp_ref[pl.ds(r, sub), :].astype(jnp.float32)
            yt = y_ref[pl.ds(r, sub), :].astype(jnp.float32)
            if masked:
                rid = row0 + r + lax.broadcasted_iota(jnp.int32, (sub, _LANE), 0)
                valid = rid < total_rows
                yp = jnp.where(valid, yp, 0.0)
                yt = jnp.where(valid, yt, 0.0)
            prod = yp * yt
            return (a_pp + fold(prod), a_p + fold(yp), a_t + fold(yt))

        zero = jnp.zeros((_SUB, _LANE), jnp.float32)
        a_pp, a_p, a_t = lax.fori_loop(0, n_chunks, body, (zero, zero, zero),
                                       unroll=unroll)
        out_ref[0, 0, :, :] += a_pp     # sum(y_pred * y)
        out_ref[0, 1, :, :] += a_p      # sum(y_pred)
        out_ref[0, 2, :, :] += a_t      # sum(y)

    if emit_ragged:
        # Only the ragged/clamped tail tile pays the mask; interior tiles take
        # the mask-free path (runtime scalar compare only).
        interior = row0 + tm <= total_rows

        @pl.when(interior)
        def _():
            accumulate(masked=False)

        @pl.when(jnp.logical_not(interior))
        def _():
            accumulate(masked=True)
    else:
        accumulate(masked=False)


def _finalize(tp, s_pred, s_true, beta):
    b2 = jnp.float32(beta * beta)
    fn = s_true - tp            # sum((1 - y_pred) * y)
    fp = s_pred - tp            # sum(y_pred * (1 - y))
    nom = (1.0 + b2) * tp
    denom = nom + b2 * fn + fp
    return nom / denom


@functools.partial(jax.jit, static_argnames=("beta", "lambda1", "tile_rows"))
def asym_similarity_loss(y_pred, y, *, beta=1.5, lambda1=0.0, tile_rows=None):
    """Pallas implementation of AsymSimiliarityLoss.forward (loss part only)."""
    del lambda1  # only used with the dead-code L1 term in the reference

    yp = y_pred.reshape(-1)     # keep native dtype; upcast happens in-kernel
    yt = y.reshape(-1)
    n = yp.shape[0]
    rows = n // _LANE
    rem = n - rows * _LANE

    # Lane tail (< 128 elements): reduced directly here instead of jnp.pad-ing
    # both full arrays through HBM just to append the tail.
    tail = None
    if rem:
        t_yp = yp[rows * _LANE:].astype(jnp.float32)
        t_yt = yt[rows * _LANE:].astype(jnp.float32)
        tail = (jnp.sum(t_yp * t_yt), jnp.sum(t_yp), jnp.sum(t_yt))

    if rows == 0:               # tiny input: no lane-aligned main slab at all
        if tail is None:
            z = jnp.float32(0.0)
            return _finalize(z, z, z, beta)
        return _finalize(tail[0], tail[1], tail[2], beta)

    if rem:
        # TODO(synk): XLA may still materialize this prefix slice for
        # lane-misaligned totals; a fully copy-free ragged path needs manual 1-D DMA.
        yp_main, yt_main = yp[: rows * _LANE], yt[: rows * _LANE]
    else:
        yp_main, yt_main = yp, yt           # reshape below is a free bitcast
    yp2 = yp_main.reshape(rows, _LANE)
    yt2 = yt_main.reshape(rows, _LANE)

    # ---- tiling: big lane-dense tiles sized from dtype bytes (~8 MiB of input
    # per step; double-buffered ~16 MiB, under the raised 32 MiB VMEM limit). --
    min_sub = max(_min_sublanes(yp2.dtype), _min_sublanes(yt2.dtype))
    sub = max(64, min_sub)                  # rows per inner fori_loop chunk
    if tile_rows is None:
        bytes_per_row = _LANE * (yp2.dtype.itemsize + yt2.dtype.itemsize)
        tm = max(sub, (_TARGET_STEP_BYTES // bytes_per_row) // sub * sub)
    else:
        tm = max(min_sub, _round_up(int(tile_rows), min_sub))
    cap = _round_up(rows, min_sub)          # smallest legal tile covering all rows
    tm = min(tm, cap)
    sub = math.gcd(tm, sub)                 # chunk divides tile, keeps dtype tiling
    total_tiles = _cdiv(rows, tm)

    # Shard row-tiles across TensorCores only where a real multi-TC split exists
    # (v7x); 1-TC chips get a single slice (no duplicate accumulator / mask cost).
    cores = _tensorcores_per_device()
    if cores > 1 and hasattr(pltpu, "CORE_PARALLEL"):
        num_slices = min(cores, total_tiles)
    else:
        num_slices = 1
    tiles_per_slice = _cdiv(total_tiles, num_slices)
    # If tiling is exact, no mask code is emitted at all; otherwise interior
    # tiles still take the unmasked path via a runtime pl.when inside the kernel.
    emit_ragged = (num_slices * tiles_per_slice * tm) != rows

    def in_map(p, t):
        bi = p * tiles_per_slice + t
        # Clamp fully-out-of-range tiles (masked to zero in-kernel) so the
        # generated DMA never reads past the array.
        return (jnp.minimum(bi, total_tiles - 1), 0)

    kernel = functools.partial(
        _asym_sim_kernel, tm=tm, sub=sub, total_rows=rows,
        tiles_per_slice=tiles_per_slice, emit_ragged=emit_ragged,
        unroll=min(4, tm // sub))

    if num_slices > 1:
        dim_sem = (pltpu.CORE_PARALLEL, pltpu.ARBITRARY)
    else:
        dim_sem = ("arbitrary", "arbitrary")

    in_bytes = rows * _LANE * (yp2.dtype.itemsize + yt2.dtype.itemsize)
    partials = pl.pallas_call(
        kernel,
        out_shape=jax.ShapeDtypeStruct((num_slices, 3, _SUB, _LANE), jnp.float32),
        grid_spec=pltpu.PrefetchScalarGridSpec(
            num_scalar_prefetch=0,
            grid=(num_slices, tiles_per_slice),
            in_specs=[
                pl.BlockSpec((tm, _LANE), in_map),
                pl.BlockSpec((tm, _LANE), in_map),
            ],
            out_specs=pl.BlockSpec((1, 3, _SUB, _LANE),
                                   lambda p, t: (p, 0, 0, 0)),
        ),
        compiler_params=pltpu.CompilerParams(
            dimension_semantics=dim_sem,
            vmem_limit_bytes=_VMEM_LIMIT_BYTES,
        ),
        cost_estimate=pl.CostEstimate(
            flops=4 * rows * _LANE,
            transcendentals=0,
            bytes_accessed=in_bytes + num_slices * 3 * _SUB * _LANE * 4,
        ),
    )(yp2, yt2)

    # Tiny epilogue: one cross-lane/sublane reduce + scalar arithmetic.
    sums = jnp.sum(partials, axis=(0, 2, 3))        # [Σ yp*y, Σ yp, Σ y]
    tp, s_pred, s_true = sums[0], sums[1], sums[2]
    if tail is not None:
        tp, s_pred, s_true = tp + tail[0], s_pred + tail[1], s_true + tail[2]
    return _finalize(tp, s_pred, s_true, beta)


def _reference_loss(y_pred, y, beta):
    y = y.astype(jnp.float32)
    yp = y_pred.astype(jnp.float32)
    b2 = beta * beta
    tp = jnp.sum(yp * y)
    nom = (1.0 + b2) * tp
    denom = (1.0 + b2) * tp + b2 * jnp.sum((1.0 - yp) * y) + jnp.sum(
        yp * (1.0 - y)
    )
    return nom / denom


if __name__ == "__main__":
    key = jax.random.PRNGKey(0)
    k1, k2, k3, k4 = jax.random.split(key, 4)

    B, C, H, W = 2, 4, 16, 16          # NCHW, matching PyTorch convention
    beta = 1.5

    y_pred = jax.nn.sigmoid(jax.random.normal(k1, (B, C, H, W), jnp.float32))
    y = (jax.random.uniform(k2, (B, C, H, W)) > 0.5).astype(jnp.float32)

    loss = jax.block_until_ready(
        asym_similarity_loss(y_pred, y, beta=beta, lambda1=0.1))
    ref = _reference_loss(y_pred, y, beta)
    assert jnp.allclose(loss, ref, rtol=1e-5, atol=1e-6), (loss, ref)

    # Ragged path: lane-misaligned total size (in-wrapper tail), a multi-tile
    # grid via a forced small tile, and the multi-TC slice path where available.
    yp_b = jax.nn.sigmoid(jax.random.normal(k3, (3, 5, 17, 19), jnp.float32))
    yt_b = (jax.random.uniform(k4, (3, 5, 17, 19)) > 0.5).astype(jnp.float32)
    loss_b = jax.block_until_ready(
        asym_similarity_loss(yp_b, yt_b, beta=beta, tile_rows=16))
    ref_b = _reference_loss(yp_b, yt_b, beta)
    assert jnp.allclose(loss_b, ref_b, rtol=1e-5, atol=1e-6), (loss_b, ref_b)

    print("KERNEL_OK")
</pallas_src>

<mosaic_0001>
module attributes {stable_mosaic.version = 11 : i64} {
  func.func @_asym_sim_kernel(%arg0: i32, %arg1: i32, %arg2: memref<16x128xf32, #tpu.memory_space<vmem>>, %arg3: memref<16x128xf32, #tpu.memory_space<vmem>>, %arg4: memref<1x3x8x128xf32, #tpu.memory_space<vmem>>) attributes {dimension_semantics = [#tpu.dimension_semantics<arbitrary>, #tpu.dimension_semantics<arbitrary>], iteration_bounds = array<i64: 1, 1>, scalar_prefetch = 0 : i64, scratch_operands = 0 : i64, tpu.core_type = #tpu.core_type<tc>, window_params = [{transform_indices = @transform_0, window_bounds = array<i64: 16, 128>}, {transform_indices = @transform_1, window_bounds = array<i64: 16, 128>}, {transform_indices = @transform_2, window_bounds = array<i64: 1, 3, 8, 128>}]} {
    %c0_i32 = arith.constant 0 : i32
    %0 = arith.cmpi eq, %arg1, %c0_i32 : i32
    %1 = arith.extui %0 : i1 to i32
    %c0_i32_0 = arith.constant 0 : i32
    %2 = arith.cmpi ne, %1, %c0_i32_0 : i32
    scf.if %2 {
      %cst_28 = arith.constant 0.000000e+00 : f32
      %38 = vector.broadcast %cst_28 : f32 to vector<1x3x8x128xf32>
      %c0_29 = arith.constant 0 : index
      %c0_30 = arith.constant 0 : index
      %c0_31 = arith.constant 0 : index
      %c0_32 = arith.constant 0 : index
      %39 = vector.load %arg4[%c0_29, %c0_30, %c0_31, %c0_32] : memref<1x3x8x128xf32, #tpu.memory_space<vmem>>, vector<1x3x8x128xf32>
      tpu.vector_store %arg4[%c0_29, %c0_30, %c0_31, %c0_32], %38 {strides = array<i32>} : memref<1x3x8x128xf32, #tpu.memory_space<vmem>>, vector<1x3x8x128xf32>,
    } else {
    }
    %cst = arith.constant 0.000000e+00 : f32
    %3 = vector.broadcast %cst : f32 to vector<8x128xf32>
    %c0_i32_1 = arith.constant 0 : i32
    %c16_i32 = arith.constant 16 : i32
    %4 = arith.muli %c0_i32_1, %c16_i32 : i32
    %5 = tpu.assume_multiple %4, 16 : i32
    %6 = arith.index_cast %5 : i32 to index
    %c0 = arith.constant 0 : index
    %7 = vector.load %arg2[%6, %c0] : memref<16x128xf32, #tpu.memory_space<vmem>>, vector<16x128xf32>
    %8 = arith.index_cast %5 : i32 to index
    %c0_2 = arith.constant 0 : index
    %9 = vector.load %arg3[%8, %c0_2] : memref<16x128xf32, #tpu.memory_space<vmem>>, vector<16x128xf32>
    %10 = arith.mulf %7, %9 : vector<16x128xf32>
    %11 = vector.shape_cast %10 : vector<16x128xf32> to vector<2x8x128xf32>
    %cst_3 = arith.constant dense<0.000000e+00> : vector<8x128xf32>
    %12 = vector.multi_reduction <add>, %11, %cst_3 [0] : vector<2x8x128xf32> to vector<8x128xf32>
    %13 = arith.addf %3, %12 : vector<8x128xf32>
    %14 = vector.shape_cast %7 : vector<16x128xf32> to vector<2x8x128xf32>
    %cst_4 = arith.constant dense<0.000000e+00> : vector<8x128xf32>
    %15 = vector.multi_reduction <add>, %14, %cst_4 [0] : vector<2x8x128xf32> to vector<8x128xf32>
    %16 = arith.addf %3, %15 : vector<8x128xf32>
    %17 = vector.shape_cast %9 : vector<16x128xf32> to vector<2x8x128xf32>
    %cst_5 = arith.constant dense<0.000000e+00> : vector<8x128xf32>
    %18 = vector.multi_reduction <add>, %17, %cst_5 [0] : vector<2x8x128xf32> to vector<8x128xf32>
    %19 = arith.addf %3, %18 : vector<8x128xf32>
    %c1_i32 = arith.constant 1 : i32
    %c0_6 = arith.constant 0 : index
    %c0_7 = arith.constant 0 : index
    %c0_8 = arith.constant 0 : index
    %c0_9 = arith.constant 0 : index
    %20 = vector.load %arg4[%c0_6, %c0_7, %c0_8, %c0_9] : memref<1x3x8x128xf32, #tpu.memory_space<vmem>>, vector<1x1x8x128xf32>
    %21 = vector.shape_cast %20 : vector<1x1x8x128xf32> to vector<8x128xf32>
    %22 = arith.addf %21, %13 : vector<8x128xf32>
    %c0_10 = arith.constant 0 : index
    %c0_11 = arith.constant 0 : index
    %c0_12 = arith.constant 0 : index
    %c0_13 = arith.constant 0 : index
    %23 = vector.load %arg4[%c0_10, %c0_11, %c0_12, %c0_13] : memref<1x3x8x128xf32, #tpu.memory_space<vmem>>, vector<1x1x8x128xf32>
    %24 = vector.shape_cast %23 : vector<1x1x8x128xf32> to vector<8x128xf32>
    %25 = vector.shape_cast %22 : vector<8x128xf32> to vector<1x1x8x128xf32>
    tpu.vector_store %arg4[%c0_10, %c0_11, %c0_12, %c0_13], %25 {strides = array<i32>} : memref<1x3x8x128xf32, #tpu.memory_space<vmem>>, vector<1x1x8x128xf32>,
    %c0_14 = arith.constant 0 : index
    %c1 = arith.constant 1 : index
    %c0_15 = arith.constant 0 : index
    %c0_16 = arith.constant 0 : index
    %26 = vector.load %arg4[%c0_14, %c1, %c0_15, %c0_16] : memref<1x3x8x128xf32, #tpu.memory_space<vmem>>, vector<1x1x8x128xf32>
    %27 = vector.shape_cast %26 : vector<1x1x8x128xf32> to vector<8x128xf32>
    %28 = arith.addf %27, %16 : vector<8x128xf32>
    %c0_17 = arith.constant 0 : index
    %c1_18 = arith.constant 1 : index
    %c0_19 = arith.constant 0 : index
    %c0_20 = arith.constant 0 : index
    %29 = vector.load %arg4[%c0_17, %c1_18, %c0_19, %c0_20] : memref<1x3x8x128xf32, #tpu.memory_space<vmem>>, vector<1x1x8x128xf32>
    %30 = vector.shape_cast %29 : vector<1x1x8x128xf32> to vector<8x128xf32>
    %31 = vector.shape_cast %28 : vector<8x128xf32> to vector<1x1x8x128xf32>
    tpu.vector_store %arg4[%c0_17, %c1_18, %c0_19, %c0_20], %31 {strides = array<i32>} : memref<1x3x8x128xf32, #tpu.memory_space<vmem>>, vector<1x1x8x128xf32>,
    %c0_21 = arith.constant 0 : index
    %c2 = arith.constant 2 : index
    %c0_22 = arith.constant 0 : index
    %c0_23 = arith.constant 0 : index
    %32 = vector.load %arg4[%c0_21, %c2, %c0_22, %c0_23] : memref<1x3x8x128xf32, #tpu.memory_space<vmem>>, vector<1x1x8x128xf32>
    %33 = vector.shape_cast %32 : vector<1x1x8x128xf32> to vector<8x128xf32>
    %34 = arith.addf %33, %19 : vector<8x128xf32>
    %c0_24 = arith.constant 0 : index
    %c2_25 = arith.constant 2 : index
    %c0_26 = arith.constant 0 : index
    %c0_27 = arith.constant 0 : index
    %35 = vector.load %arg4[%c0_24, %c2_25, %c0_26, %c0_27] : memref<1x3x8x128xf32, #tpu.memory_space<vmem>>, vector<1x1x8x128xf32>
    %36 = vector.shape_cast %35 : vector<1x1x8x128xf32> to vector<8x128xf32>
    %37 = vector.shape_cast %34 : vector<8x128xf32> to vector<1x1x8x128xf32>
    tpu.vector_store %arg4[%c0_24, %c2_25, %c0_26, %c0_27], %37 {strides = array<i32>} : memref<1x3x8x128xf32, #tpu.memory_space<vmem>>, vector<1x1x8x128xf32>,
    return
  }
  func.func @transform_0(%arg0: i32, %arg1: i32) -> (i32, i32) {
    %c1_i32 = arith.constant 1 : i32
    %0 = arith.muli %arg0, %c1_i32 : i32
    %1 = arith.addi %0, %arg1 : i32
    %c0_i32 = arith.constant 0 : i32
    %2 = arith.minsi %1, %c0_i32 : i32
    %c0_i32_0 = arith.constant 0 : i32
    %c0_i32_1 = arith.constant 0 : i32
    return %2, %c0_i32_0 : i32, i32
  }
  func.func @transform_1(%arg0: i32, %arg1: i32) -> (i32, i32) {
    %c1_i32 = arith.constant 1 : i32
    %0 = arith.muli %arg0, %c1_i32 : i32
    %1 = arith.addi %0, %arg1 : i32
    %c0_i32 = arith.constant 0 : i32
    %2 = arith.minsi %1, %c0_i32 : i32
    %c0_i32_0 = arith.constant 0 : i32
    %c0_i32_1 = arith.constant 0 : i32
    return %2, %c0_i32_0 : i32, i32
  }
  func.func @transform_2(%arg0: i32, %arg1: i32) -> (i32, i32, i32, i32) {
    %c0_i32 = arith.constant 0 : i32
    %c0_i32_0 = arith.constant 0 : i32
    %c0_i32_1 = arith.constant 0 : i32
    %c0_i32_2 = arith.constant 0 : i32
    return %arg0, %c0_i32, %c0_i32_0, %c0_i32_1 : i32, i32, i32, i32
  }
}

</mosaic_0001>

<bundles_post_ra>
// kernel: asym_similarity_loss.1
= control target key start
LH: loop header
LB: loop body
LE: loop exit
PB: predicated region body
PF: predicated region fallthrough
CT: control target
= control target key end

     0   :  { %s162_s0 = inlined_call_operand.vmem [shape: f32[16,128], index: 0, kind: input, shape index: {}]   ;;  %s163_s1 = inlined_call_operand.vmem [shape: f32[16,128], index: 1, kind: input, shape index: {}]   ;;  %s164_s2 = inlined_call_operand.vmem [shape: f32[1,3,8,128], index: 2, kind: output, shape index: {}]  }
   0x1   :  { %v82_v0 = vld [vmem:[%s162_s0] sm:$0xff]  ;;  %v83_v1 = vld [vmem:[%s162_s0 + $0x8] sm:$0xff] }
   0x2   :  { %v84_v2 = vld [vmem:[%s163_s1] sm:$0xff]  ;;  %v85_v3 = vld [vmem:[%s163_s1 + $0x8] sm:$0xff]  ;;  %v90_v5 = vadd.f32 %v83_v1, %v82_v0 }
   0x3   :  { %v86_v4 = vmul.f32 %v84_v2, %v82_v0  ;;  %v87_v6 = vmul.f32 %v85_v3, %v83_v1  ;;  %v92_v7 = vadd.f32 %v85_v3, %v84_v2 }
   0x4   :  { %122 = vst [vmem:[%s164_s2 + $0x8] sm:$0xff] %v90_v5 }
   0x5   :  { %v88_v8 = vadd.f32 %v87_v6, %v86_v4  ;;  %124 = vst [vmem:[%s164_s2 + $0x10] sm:$0xff] %v92_v7 }
   0x7   :  { %96 = vst [vmem:[%s164_s2] sm:$0xff] %v88_v8 }

</bundles_post_ra>
